<compile_context>
chip_gen: v6e
topology: v6e:2x2x1
jax: 0.10.0
libtpu: 0.0.40
codegen_flags: <defaults>
</compile_context>

<pallas_src>
import jax
import jax.numpy as jnp
from jax.experimental import pallas as pl
from jax.experimental.pallas import tpu as pltpu


def _gru_cell_kernel(x_ref, h_ref, wx3_ref, wh2_ref, whh_ref, b_ref, out_ref):
    """Single fused GRU cell step (one batch tile).

    x_ref  : (tb, D)   float32
    h_ref  : (tb, H)   float32   (aliased with out_ref's buffer)
    wx3_ref: (D, 3H)   bfloat16  columns: [W_zx | W_rx | W_hx]
    wh2_ref: (D, 2H)   bfloat16  columns: [W_zh | W_rh]
    whh_ref: (H, H)    bfloat16
    b_ref  : (1, 3H)   float32   [b_zx+b_zh | b_rx+b_rh | b_hx+b_hh]
    out_ref: (tb, H)   float32
    """
    hidden = whh_ref.shape[-1]
    h = h_ref[...]                                   # f32, kept for the blend

    # bf16 operands, f32 accumulation on the MXU.
    x_bf = x_ref[...].astype(jnp.bfloat16)
    h_bf = h.astype(jnp.bfloat16)

    gx = (
        jnp.dot(x_bf, wx3_ref[...], preferred_element_type=jnp.float32)
        + b_ref[...]
    )                                                # (tb, 3H) f32
    gh = jnp.dot(h_bf, wh2_ref[...], preferred_element_type=jnp.float32)  # (tb, 2H)

    # One EUP pass over the whole z|r tile, then lane-slice.
    zr = jax.nn.sigmoid(gx[:, : 2 * hidden] + gh)
    z = zr[:, :hidden]
    r = zr[:, hidden: 2 * hidden]

    # Dependent recurrent matmul: (r*h) @ W_hh.
    rh_bf = (r * h).astype(jnp.bfloat16)
    h_bar = jax.nn.sigmoid(
        gx[:, 2 * hidden:]
        + jnp.dot(rh_bf, whh_ref[...], preferred_element_type=jnp.float32)
    )

    # h_new = (1 - z) * h + z * h_bar
    out_ref[...] = h + z * (h_bar - h)


@jax.jit
def gru_cell_forward(x, h, w_x3, w_h2, w_hh, b):
    """x, h: (B, D) f32; w_x3: (D, 3H); w_h2: (D, 2H); w_hh: (H, H); b: (1, 3H)."""
    batch, in_dim = x.shape
    hidden = w_hh.shape[-1]

    # Pick a batch tile (multiple of 8 sublanes); pad batch to a multiple of it.
    padded = ((batch + 7) // 8) * 8
    tb = min(128, padded)
    padded = ((padded + tb - 1) // tb) * tb
    pad = padded - batch
    if pad:
        x = jnp.pad(x, ((0, pad), (0, 0)))
        h = jnp.pad(h, ((0, pad), (0, 0)))

    # bf16 weights: half the HBM weight bytes; accumulation stays f32 in-kernel.
    w_x3 = w_x3.astype(jnp.bfloat16)
    w_h2 = w_h2.astype(jnp.bfloat16)
    w_hh = w_hh.astype(jnp.bfloat16)
    b = b.astype(jnp.float32)

    # Explicit scoped-VMEM budget derived from the real footprint (double-buffer
    # margin on the batch tiles; weights are single-copy resident).
    weight_bytes = sum(a.size * a.dtype.itemsize for a in (w_x3, w_h2, w_hh, b))
    tile_bytes = 2 * (tb * in_dim + 2 * tb * hidden) * 4
    vmem_limit = int(min(100 << 20, max(weight_bytes + tile_bytes + (1 << 20),
                                        16 << 20)))

    grid = (padded // tb,)
    out = pl.pallas_call(
        _gru_cell_kernel,
        out_shape=jax.ShapeDtypeStruct((padded, hidden), jnp.float32),
        grid=grid,
        in_specs=[
            pl.BlockSpec((tb, in_dim), lambda i: (i, 0)),          # x  (batch-tiled)
            pl.BlockSpec((tb, hidden), lambda i: (i, 0)),          # h  (batch-tiled)
            pl.BlockSpec((in_dim, 3 * hidden), lambda i: (0, 0)),  # W_x3 (resident)
            pl.BlockSpec((in_dim, 2 * hidden), lambda i: (0, 0)),  # W_h2 (resident)
            pl.BlockSpec((hidden, hidden), lambda i: (0, 0)),      # W_hh (resident)
            pl.BlockSpec((1, 3 * hidden), lambda i: (0, 0)),       # bias (resident)
        ],
        out_specs=pl.BlockSpec((tb, hidden), lambda i: (i, 0)),
        input_output_aliases={1: 0},                                # h buffer -> out
        compiler_params=pltpu.CompilerParams(
            dimension_semantics=("parallel",),
            vmem_limit_bytes=vmem_limit,
        ),
    )(x, h, w_x3, w_h2, w_hh, b)

    return out[:batch] if pad else out


def _make_params(key, input_dim, hidden_dim):
    """Synthetic parameters mirroring six nn.Linear(input_dim, hidden_dim).

    Returns the fused kernel parameters and the raw per-layer parameters
    (for the pure-JAX reference).
    """
    bound = 1.0 / (input_dim ** 0.5)
    ks = jax.random.split(key, 12)

    def lin(kw, kb):
        w = jax.random.uniform(kw, (input_dim, hidden_dim), jnp.float32, -bound, bound)
        bb = jax.random.uniform(kb, (hidden_dim,), jnp.float32, -bound, bound)
        return w, bb

    w_zx, b_zx = lin(ks[0], ks[1])
    w_zh, b_zh = lin(ks[2], ks[3])
    w_rx, b_rx = lin(ks[4], ks[5])
    w_rh, b_rh = lin(ks[6], ks[7])
    w_hx, b_hx = lin(ks[8], ks[9])
    w_hh, b_hh = lin(ks[10], ks[11])

    raw = dict(w_zx=w_zx, b_zx=b_zx, w_zh=w_zh, b_zh=b_zh,
               w_rx=w_rx, b_rx=b_rx, w_rh=w_rh, b_rh=b_rh,
               w_hx=w_hx, b_hx=b_hx, w_hh=w_hh, b_hh=b_hh)

    # Fused weights: no zero block, no K-concat needed at call time.
    w_x3 = jnp.concatenate([w_zx, w_rx, w_hx], axis=1)                   # (D, 3H)
    w_h2 = jnp.concatenate([w_zh, w_rh], axis=1)                         # (D, 2H)
    b = jnp.concatenate([b_zx + b_zh, b_rx + b_rh, b_hx + b_hh])[None, :]  # (1, 3H)
    return (w_x3, w_h2, w_hh, b), raw


def _reference_gru_cell(x, h, p):
    """Pure-JAX reference of the exact PyTorch GRUCell semantics (f32)."""
    z = jax.nn.sigmoid(x @ p["w_zx"] + p["b_zx"] + h @ p["w_zh"] + p["b_zh"])
    r = jax.nn.sigmoid(x @ p["w_rx"] + p["b_rx"] + h @ p["w_rh"] + p["b_rh"])
    h_ = jax.nn.sigmoid(x @ p["w_hx"] + p["b_hx"] + (r * h) @ p["w_hh"] + p["b_hh"])
    return (1 - z) * h + z * h_


if __name__ == "__main__":
    # Small shapes consistent with the module: batch=4,
    # input_dim == hidden_dim == 32 (required for h to feed back through the
    # Linear layers and blend with the new hidden state).
    batch, dim = 4, 32

    key = jax.random.PRNGKey(0)
    k_x, k_h, k_p = jax.random.split(key, 3)
    x = jax.random.normal(k_x, (batch, dim), jnp.float32)
    h0 = jax.random.normal(k_h, (batch, dim), jnp.float32)
    (w_x3, w_h2, w_hh, b), raw = _make_params(k_p, dim, dim)

    out = gru_cell_forward(x, h0, w_x3, w_h2, w_hh, b)
    out = jax.block_until_ready(out)

    ref = _reference_gru_cell(x, h0, raw)
    assert out.shape == (batch, dim)
    # Tolerance reflects bf16 matmul operands (f32 accumulation / gate math).
    assert jnp.allclose(out, ref, atol=3e-2, rtol=3e-2), "mismatch vs reference"

    print("KERNEL_OK")
</pallas_src>

<mosaic_0001>
module attributes {stable_mosaic.version = 11 : i64} {
  func.func @_gru_cell_kernel(%arg0: i32, %arg1: memref<8x32xf32, #tpu.memory_space<vmem>>, %arg2: memref<8x32xf32, #tpu.memory_space<vmem>>, %arg3: memref<32x96xbf16, #tpu.memory_space<vmem>>, %arg4: memref<32x64xbf16, #tpu.memory_space<vmem>>, %arg5: memref<32x32xbf16, #tpu.memory_space<vmem>>, %arg6: memref<1x96xf32, #tpu.memory_space<vmem>>, %arg7: memref<8x32xf32, #tpu.memory_space<vmem>>) attributes {dimension_semantics = [#tpu.dimension_semantics<parallel>], iteration_bounds = array<i64: 1>, scalar_prefetch = 0 : i64, scratch_operands = 0 : i64, tpu.core_type = #tpu.core_type<tc>, window_params = [{transform_indices = @transform_0, window_bounds = array<i64: 8, 32>}, {transform_indices = @transform_1, window_bounds = array<i64: 8, 32>}, {pipeline_mode = #tpu.pipeline_mode<synchronous>, transform_indices = @transform_2, window_bounds = array<i64: 32, 96>}, {pipeline_mode = #tpu.pipeline_mode<synchronous>, transform_indices = @transform_3, window_bounds = array<i64: 32, 64>}, {pipeline_mode = #tpu.pipeline_mode<synchronous>, transform_indices = @transform_4, window_bounds = array<i64: 32, 32>}, {pipeline_mode = #tpu.pipeline_mode<synchronous>, transform_indices = @transform_5, window_bounds = array<i64: 1, 96>}, {transform_indices = @transform_6, window_bounds = array<i64: 8, 32>}]} {
    %c0 = arith.constant 0 : index
    %c0_0 = arith.constant 0 : index
    %0 = vector.load %arg2[%c0, %c0_0] : memref<8x32xf32, #tpu.memory_space<vmem>>, vector<8x32xf32>
    %c0_1 = arith.constant 0 : index
    %c0_2 = arith.constant 0 : index
    %1 = vector.load %arg1[%c0_1, %c0_2] : memref<8x32xf32, #tpu.memory_space<vmem>>, vector<8x32xf32>
    %2 = arith.truncf %1 : vector<8x32xf32> to vector<8x32xbf16>
    %3 = arith.truncf %0 : vector<8x32xf32> to vector<8x32xbf16>
    %c0_3 = arith.constant 0 : index
    %c0_4 = arith.constant 0 : index
    %4 = vector.load %arg3[%c0_3, %c0_4] : memref<32x96xbf16, #tpu.memory_space<vmem>>, vector<32x96xbf16>
    %cst = arith.constant dense<0.000000e+00> : vector<8x96xf32>
    %5 = tpu.matmul %2, %4, %cst {dimension_numbers = #tpu.dot_dimension_numbers<[1], [0], [0], [1], [0, 0, 1, 1], [], []>} : vector<8x32xbf16>, vector<32x96xbf16>, vector<8x96xf32> -> vector<8x96xf32>
    %c0_5 = arith.constant 0 : index
    %c0_6 = arith.constant 0 : index
    %6 = vector.load %arg6[%c0_5, %c0_6] : memref<1x96xf32, #tpu.memory_space<vmem>>, vector<1x96xf32>
    %7 = vector.broadcast %6 : vector<1x96xf32> to vector<8x96xf32>
    %8 = arith.addf %5, %7 : vector<8x96xf32>
    %c0_7 = arith.constant 0 : index
    %c0_8 = arith.constant 0 : index
    %9 = vector.load %arg4[%c0_7, %c0_8] : memref<32x64xbf16, #tpu.memory_space<vmem>>, vector<32x64xbf16>
    %cst_9 = arith.constant dense<0.000000e+00> : vector<8x64xf32>
    %10 = tpu.matmul %3, %9, %cst_9 {dimension_numbers = #tpu.dot_dimension_numbers<[1], [0], [0], [1], [0, 0, 1, 1], [], []>} : vector<8x32xbf16>, vector<32x64xbf16>, vector<8x64xf32> -> vector<8x64xf32>
    %11 = vector.extract_strided_slice %8 {offsets = [0, 0], sizes = [8, 64], strides = [1, 1]} : vector<8x96xf32> to vector<8x64xf32>
    %12 = arith.addf %11, %10 : vector<8x64xf32>
    %13 = arith.negf %12 : vector<8x64xf32>
    %14 = math.exp %13 : vector<8x64xf32>
    %cst_10 = arith.constant 1.000000e+00 : f32
    %15 = vector.broadcast %cst_10 : f32 to vector<8x64xf32>
    %16 = arith.addf %15, %14 : vector<8x64xf32>
    %17 = arith.divf %15, %16 : vector<8x64xf32>
    %18 = vector.extract_strided_slice %17 {offsets = [0, 0], sizes = [8, 32], strides = [1, 1]} : vector<8x64xf32> to vector<8x32xf32>
    %19 = vector.extract_strided_slice %17 {offsets = [0, 32], sizes = [8, 32], strides = [1, 1]} : vector<8x64xf32> to vector<8x32xf32>
    %20 = arith.mulf %19, %0 : vector<8x32xf32>
    %21 = arith.truncf %20 : vector<8x32xf32> to vector<8x32xbf16>
    %22 = vector.extract_strided_slice %8 {offsets = [0, 64], sizes = [8, 32], strides = [1, 1]} : vector<8x96xf32> to vector<8x32xf32>
    %c0_11 = arith.constant 0 : index
    %c0_12 = arith.constant 0 : index
    %23 = vector.load %arg5[%c0_11, %c0_12] : memref<32x32xbf16, #tpu.memory_space<vmem>>, vector<32x32xbf16>
    %cst_13 = arith.constant dense<0.000000e+00> : vector<8x32xf32>
    %24 = tpu.matmul %21, %23, %cst_13 {dimension_numbers = #tpu.dot_dimension_numbers<[1], [0], [0], [1], [0, 0, 1, 1], [], []>} : vector<8x32xbf16>, vector<32x32xbf16>, vector<8x32xf32> -> vector<8x32xf32>
    %25 = arith.addf %22, %24 : vector<8x32xf32>
    %26 = arith.negf %25 : vector<8x32xf32>
    %27 = math.exp %26 : vector<8x32xf32>
    %cst_14 = arith.constant 1.000000e+00 : f32
    %28 = vector.broadcast %cst_14 : f32 to vector<8x32xf32>
    %29 = arith.addf %28, %27 : vector<8x32xf32>
    %30 = arith.divf %28, %29 : vector<8x32xf32>
    %31 = arith.subf %30, %0 : vector<8x32xf32>
    %32 = arith.mulf %18, %31 : vector<8x32xf32>
    %33 = arith.addf %0, %32 : vector<8x32xf32>
    %c0_15 = arith.constant 0 : index
    %c0_16 = arith.constant 0 : index
    %34 = vector.load %arg7[%c0_15, %c0_16] : memref<8x32xf32, #tpu.memory_space<vmem>>, vector<8x32xf32>
    tpu.vector_store %arg7[%c0_15, %c0_16], %33 {strides = array<i32>} : memref<8x32xf32, #tpu.memory_space<vmem>>, vector<8x32xf32>,
    return
  }
  func.func @transform_0(%arg0: i32) -> (i32, i32) {
    %c0_i32 = arith.constant 0 : i32
    %c0_i32_0 = arith.constant 0 : i32
    return %arg0, %c0_i32 : i32, i32
  }
  func.func @transform_1(%arg0: i32) -> (i32, i32) {
    %c0_i32 = arith.constant 0 : i32
    %c0_i32_0 = arith.constant 0 : i32
    return %arg0, %c0_i32 : i32, i32
  }
  func.func @transform_2(%arg0: i32) -> (i32, i32) {
    %c0_i32 = arith.constant 0 : i32
    %c0_i32_0 = arith.constant 0 : i32
    %c0_i32_1 = arith.constant 0 : i32
    return %c0_i32, %c0_i32_0 : i32, i32
  }
  func.func @transform_3(%arg0: i32) -> (i32, i32) {
    %c0_i32 = arith.constant 0 : i32
    %c0_i32_0 = arith.constant 0 : i32
    %c0_i32_1 = arith.constant 0 : i32
    return %c0_i32, %c0_i32_0 : i32, i32
  }
  func.func @transform_4(%arg0: i32) -> (i32, i32) {
    %c0_i32 = arith.constant 0 : i32
    %c0_i32_0 = arith.constant 0 : i32
    %c0_i32_1 = arith.constant 0 : i32
    return %c0_i32, %c0_i32_0 : i32, i32
  }
  func.func @transform_5(%arg0: i32) -> (i32, i32) {
    %c0_i32 = arith.constant 0 : i32
    %c0_i32_0 = arith.constant 0 : i32
    %c0_i32_1 = arith.constant 0 : i32
    return %c0_i32, %c0_i32_0 : i32, i32
  }
  func.func @transform_6(%arg0: i32) -> (i32, i32) {
    %c0_i32 = arith.constant 0 : i32
    %c0_i32_0 = arith.constant 0 : i32
    return %arg0, %c0_i32 : i32, i32
  }
}

</mosaic_0001>

<bundles_post_ra>
// kernel: gru_cell_forward.1
= control target key start
LH: loop header
LB: loop body
LE: loop exit
PB: predicated region body
PF: predicated region fallthrough
CT: control target
= control target key end

     0   :  { %v319_v0 = vmov 0.0   ;;  %vm320_vm0 = vmmov 0   ;;  %s321_s9 = smov 32   ;;  %vm51_vm1 = vcmask 261120   ;;  %s403_s2 = inlined_call_operand.vmem [shape: bf16[32,96], index: 2, kind: input, shape index: {}]   ;;  %s404_s3 = inlined_call_operand.vmem [shape: bf16[32,64], index: 3, kind: input, shape index: {}]   ;;  %s405_s0 = inlined_call_operand.vmem [shape: f32[8,32], index: 0, kind: input, shape index: {}]   ;;  %s406_s1 = inlined_call_operand.vmem [shape: f32[8,32], index: 1, kind: input, shape index: {}, may-alias: {1,6}]   ;;  %s407_s4 = inlined_call_operand.vmem [shape: bf16[32,32], index: 4, kind: input, shape index: {}]   ;;  %s408_s5 = inlined_call_operand.vmem [shape: f32[1,96], index: 5, kind: input, shape index: {}]   ;;  %s409_s6 = inlined_call_operand.vmem [shape: f32[8,32], index: 6, kind: output, shape index: {}, may-alias: {1,6}]  }
   0x1   :  { %276 = vmatprep.subr.bf16.mxu0 %v319_v0  ;;  %284 = vmatprep.subr.bf16.mxu1 %v319_v0  ;;  %v305_v1 = vld [vmem:[%s403_s2 + $0x8] sm:$0xff]   ;;  %v307_v3 = vld [vmem:[%s403_s2] sm:$0xff]  }
   0x2   :  { %v306_v2 = vld [vmem:[%s404_s3 + $0x8] sm:$0xff]   ;;  %280 = vmatprep.mubr.msk.bf16.mxu0 %vm320_vm0, %v319_v0  ;;  %288 = vmatprep.mubr.msk.bf16.mxu1 %vm320_vm0, %v319_v0  ;;  %v308_v4 = vld [vmem:[%s404_s3] sm:$0xff]  }
   0x3   :  { %277 = vmatpush3.bf16.msra.mxu0 %v305_v1  ;;  %285 = vmatpush3.bf16.msra.mxu1 %v306_v2  ;;  %v25_v5 = vld [vmem:[%s405_s0] sm:$0xff]  ;;  %v309_v9 = vld [vmem:[%s407_s4 + $0x8] sm:$0xff]  }
   0x4   :  { %278 = vmatprep.subr.bf16.mxu0 %v319_v0  ;;  %286 = vmatprep.subr.bf16.mxu1 %v319_v0  ;;  %v379_v6 = vld [vmem:[%s406_s1] sm:$0xff]  ;;  %v26_v7 = vpack.c.bf16 %v25_v5, %v25_v5 }
   0x5   :  { %162 = vrot.lane.b32.xlu0 %v379_v6, %s321_s9  ;;  %v27_v8 = vpack.c.bf16 %v379_v6, %v379_v6  ;;  %v310_v10 = vld [vmem:[%s407_s4] sm:$0xff]   ;;  %s322_s4 = smov 96  }
   0x6   :  { %v255_v11 = vld [vmem:[%s408_s5] ss:$0 sm:$0xff]  ;;  %s323_s5 = smov 64  }
   0x7   :  { %279 = vmatpush3.bf16.msra.mxu0 %v307_v3  ;;  %287 = vmatpush3.bf16.msra.mxu1 %v308_v4 }
   0x8   :  { %292 = vmatprep.subr.bf16.mxu0 %v319_v0 }
   0xa   :  { %281 = vmatmul.mubr.msk.bf16.vlgmr.msra.gmra.mxu0 %vm51_vm1, %v26_v7  ;;  %289 = vmatmul.mubr.msk.bf16.vlgmr.msra.gmra.mxu1 %vm51_vm1, %v27_v8 }
   0xb   :  { %296 = vmatprep.mubr.msk.bf16.mxu0 %vm320_vm0, %v319_v0  ;;  %293 = vmatpush3.bf16.msra.mxu0 %v309_v9 }
   0xc   :  { %294 = vmatprep.subr.bf16.mxu0 %v319_v0 }
   0xf   :  { %295 = vmatpush3.bf16.msra.mxu0 %v310_v10 }
  0x77   :  { %v163_v25 = vpop.permute.xlu0 %162 }
  0xca   :  { %v89_v12 = vpop.f32.mrf.mxu0  ;;  %v148_v14 = vpop.f32.mrf.mxu1 }
  0xcb   :  { %v90_v13 = vadd.f32 %v255_v11, %v89_v12 }
  0xcc   :  { %v282_v15 = vpop.f32.mrf.mxu0  ;;  %v290_v17 = vpop.f32.mrf.mxu1 }
  0xcd   :  { %v154_v16 = vadd.f32 %v148_v14, %v90_v13 }
  0xce   :  { %v92_v18 = vpop.f32.mrf.mxu0  ;;  %v151_v20 = vpop.f32.mrf.mxu1 }
  0xcf   :  { %v262_v19 = vmul.f32 -1.442695, %v154_v16 }
  0xd0   :  { %v283_v21 = vpop.f32.mrf.mxu0  ;;  %v291_v22 = vpop.f32.mrf.mxu1 }
  0xd1   :  { %311 = vpow2.f32 %v262_v19 }
  0xde   :  { %v312_v23 = vpop.eup %311 }
  0xdf   :  { %v158_v24 = vadd.f32 1.0, %v312_v23 }
  0xe1   :  { %313 = vrcp.f32 %v158_v24 }
  0xee   :  { %v314_v26 = vpop.eup %313 }
  0xef   :  { %v165_v27 = vmul.f32 %v314_v26, %v163_v25 }
  0xf1   :  { %v166_v28 = vpack.c.bf16 %v165_v27, %v165_v27 }
  0xf3   :  { %172 = vrot.lane.b32.xlu0 %v166_v28, %s322_s4 }
 0x165   :  { %v173_v29 = vpop.permute.xlu0 %172 }
 0x166   :  { %297 = vmatmul.mubr.msk.bf16.vlgmr.msra.gmra.mxu0 %vm51_vm1, %v173_v29 }
 0x226   :  { %v223_v30 = vpop.f32.mrf.mxu0 }
 0x227   :  { %230 = vrot.lane.b32.xlu1 %v223_v30, %s323_s5 }
 0x228   :  { %v298_v31 = vpop.f32.mrf.mxu0 }
 0x22a   :  { %v226_v32 = vpop.f32.mrf.mxu0 }
 0x22b   :  { %240 = vrot.lane.b32.xlu1 %v379_v6, %s323_s5 }
 0x22c   :  { %v299_v33 = vpop.f32.mrf.mxu0 }
 0x299   :  { %v231_v34 = vpop.permute.xlu1 %230 }
 0x29a   :  { %v233_v35 = vadd.f32 %v231_v34, %v90_v13 }
 0x29c   :  { %v266_v36 = vmul.f32 -1.442695, %v233_v35 }
 0x29d   :  { %v241_v39 = vpop.permute.xlu1 %240 }
 0x29e   :  { %315 = vpow2.f32 %v266_v36 }
 0x2ab   :  { %v316_v37 = vpop.eup %315 }
 0x2ac   :  { %v237_v38 = vadd.f32 1.0, %v316_v37 }
 0x2ae   :  { %317 = vrcp.f32 %v237_v38 }
 0x2bb   :  { %v318_v40 = vpop.eup %317 }
 0x2bc   :  { %v243_v41 = vsub.f32 %v318_v40, %v241_v39 }
 0x2be   :  { %245 = vrot.lane.b32.xlu0 %v243_v41, %s323_s5 }
 0x330   :  { %v246_v42 = vpop.permute.xlu0 %245 }
 0x331   :  { %v248_v43 = vmul.f32 %v314_v26, %v246_v42 }
 0x333   :  { %v249_v44 = vadd.f32 %v248_v43, %v379_v6 }
 0x335   :  { %250 = vst.msk [vmem:[%s409_s6] sm:$0xff] %vm51_vm1, %v249_v44 }

</bundles_post_ra>
